<compile_context>
chip_gen: v7x
topology: tpu7x:2x2x1
jax: 0.10.0
libtpu: 0.0.40
codegen_flags: <defaults>
</compile_context>

<pallas_src>
import math
import functools

import jax
import jax.numpy as jnp
from jax.experimental import pallas as pl
from jax.experimental.pallas import tpu as pltpu


# ----------------------------------------------------------------------------- helpers
def _round_up(v, m):
    return ((v + m - 1) // m) * m


def _gelu(h, exact):
    if exact:
        # F.gelu default: exact erf-based GELU
        return 0.5 * h * (1.0 + jax.lax.erf(h * 0.7071067811865476))
    # tanh approximation (fallback only)
    c = 0.7978845608028654  # sqrt(2/pi)
    return 0.5 * h * (1.0 + jnp.tanh(c * (h + 0.044715 * h * h * h)))


def _pick_vmem_limit():
    # ~3/4 of physical VMEM: ~96 MiB on v5e/v6e (128 MiB physical), ~48 MiB on v7x (64 MiB).
    try:
        cap = getattr(pltpu.get_tpu_info(), "vmem_capacity_bytes", None)
        if cap:
            return int(min(cap * 3 // 4, 100 * 1024 * 1024))
    except Exception:
        pass
    return 48 * 1024 * 1024


# ------------------------------------------------------------ grouped expert GLU kernel
def _moe_grouped_kernel(eid_ref, cnt_ref, sides_ref, x_ref, w12_ref, w3_ref, out_ref,
                        *, hidden, exact_gelu):
    # eid_ref / cnt_ref : SMEM (n_blocks,) int32  -- per work block: expert id, # real tokens
    # sides_ref         : VMEM (tn, 2) f32        -- [a (expert-out coeff), b (x fallback coeff)]
    # x_ref             : VMEM (tn, D) bf16       -- tokens of ONE expert (sorted, padded layout)
    # w12_ref           : VMEM (1, D, 2*Hp) bf16  -- [w1 | w2] slice of this block's expert
    # w3_ref            : VMEM (1, Hp, D) bf16
    # out_ref           : VMEM (tn, D)            -- written exactly once per block
    g = pl.program_id(0)

    @pl.when(cnt_ref[g] > 0)
    def _():
        x = x_ref[...]                                                      # (tn, D) bf16
        # Fused GLU: one MXU pass of x through [w1 | w2] (2*Hp lanes, 256-aligned), then split.
        h12 = jnp.dot(x, w12_ref[0], preferred_element_type=jnp.float32)    # (tn, 2Hp) f32
        h = h12[:, :hidden] * h12[:, hidden:]                               # w1(x) * w2(x), lane-aligned halves
        h = _gelu(h, exact_gelu)
        y = jnp.dot(h.astype(x.dtype), w3_ref[0],
                    preferred_element_type=jnp.float32)                     # (tn, D) f32
        a = sides_ref[:, 0:1]                                               # (tn, 1)
        b = sides_ref[:, 1:2]                                               # (tn, 1)
        out_ref[...] = (a * y + b * x.astype(jnp.float32)).astype(out_ref.dtype)

    @pl.when(cnt_ref[g] == 0)                                               # trailing all-padding blocks only
    def _():
        out_ref[...] = jnp.zeros_like(out_ref)


def _moe_grouped_matmul(blk_eid, blk_cnt, sides, xg, w12, w3, *, hidden, out_dtype,
                        exact_gelu, block_tokens):
    rows, D = xg.shape
    _, _, H2 = w12.shape
    n_blocks = rows // block_tokens

    kernel = functools.partial(_moe_grouped_kernel, hidden=hidden, exact_gelu=exact_gelu)

    flops = int(2 * rows * (D * H2 + hidden * D))
    transcendentals = int(rows * hidden)
    bytes_accessed = int(xg.size * xg.dtype.itemsize
                         + rows * D * jnp.dtype(out_dtype).itemsize
                         + w12.size * w12.dtype.itemsize
                         + w3.size * w3.dtype.itemsize
                         + sides.size * 4)

    return pl.pallas_call(
        kernel,
        out_shape=jax.ShapeDtypeStruct((rows, D), out_dtype),
        grid_spec=pltpu.PrefetchScalarGridSpec(
            num_scalar_prefetch=2,                                # blk_eid, blk_cnt -> SMEM
            grid=(n_blocks,),
            in_specs=[
                pl.BlockSpec((block_tokens, 2), lambda g, eid, cnt: (g, 0)),            # [a, b]
                pl.BlockSpec((block_tokens, D), lambda g, eid, cnt: (g, 0)),            # grouped tokens (bf16)
                pl.BlockSpec((1, D, H2), lambda g, eid, cnt: (eid[g], 0, 0)),           # expert w12 slice
                pl.BlockSpec((1, hidden, D), lambda g, eid, cnt: (eid[g], 0, 0)),       # expert w3 slice
            ],
            out_specs=pl.BlockSpec((block_tokens, D), lambda g, eid, cnt: (g, 0)),
        ),
        compiler_params=pltpu.CompilerParams(
            dimension_semantics=("parallel",),                    # each block written once -> megacore-splittable
            vmem_limit_bytes=_pick_vmem_limit(),
        ),
        cost_estimate=pl.CostEstimate(flops=flops, transcendentals=transcendentals,
                                      bytes_accessed=bytes_accessed),
    )(blk_eid, blk_cnt, sides, xg, w12, w3)


# --------------------------------------------------------------------- routing (JAX glue)
def _routing(logits, num_experts, top_k, expert_capacity, dtype):
    # TODO(synk): top-k / sort / capacity double-cumsum routing has no clean Pallas TPU
    # primitive, so this (tiny) part stays in plain JAX/XLA.
    N = logits.shape[0]
    vals, idx = jax.lax.top_k(logits, top_k)                                # (N, K)
    scores = jax.nn.softmax(vals, axis=-1).astype(dtype)                    # (N, K)
    onehot = jax.nn.one_hot(idx, num_experts, dtype=jnp.float32)            # (N, K, E)
    pos = jnp.cumsum(jnp.cumsum(onehot, axis=0), axis=1).astype(jnp.int32)
    cap = math.floor(N * expert_capacity)
    emask = onehot * (pos < cap).astype(jnp.float32)                        # (N, K, E)
    tam = jnp.sum(emask, axis=-1)                                           # (N, K) kept-slot mask
    eff = jnp.einsum("tke,e->tk", emask,
                     jnp.arange(num_experts, dtype=jnp.float32)).astype(jnp.int32)
    return scores, tam, eff


def moe_block_forward(x, params, *, num_experts, top_k, expert_capacity,
                      exact_gelu=True, block_tokens=256, compute_dtype=jnp.bfloat16):
    b, t, D = x.shape
    N = b * t
    E = num_experts
    x_flat = x.reshape(N, D)

    # ---- router + capacity routing (XLA)
    logits = x_flat.astype(jnp.float32) @ params["router_w"] + params["router_b"]
    scores, tam, eff = _routing(logits, E, top_k, expert_capacity, x.dtype)

    # PyTorch's per-expert loop overwrites all K slots with the highest matching expert id.
    i_sel = jnp.max(eff, axis=-1).astype(jnp.int32)                         # (N,)
    kept = (tam > 0).astype(jnp.float32)                                    # (N, K)
    sc32 = scores.astype(jnp.float32)
    a = jnp.sum(sc32 * kept, axis=-1)                                       # (N,) expert-output coeff
    bcoef = jnp.sum(sc32 * (1.0 - kept), axis=-1)                           # (N,) x-fallback coeff

    # ---- grouped dispatch prep: sort tokens by expert, pad each expert range to a tile multiple
    tn = _round_up(max(int(block_tokens), 16), 16)                          # bf16 sublane tile friendly
    g_max = pl.cdiv(N, tn) + E                                              # static worst-case # work blocks
    order = jnp.argsort(i_sel)                                              # stable
    counts = jnp.zeros((E,), jnp.int32).at[i_sel].add(1)                    # tokens per expert
    bpe = (counts + tn - 1) // tn                                           # blocks per expert
    block_ends = jnp.cumsum(bpe)
    block_starts = block_ends - bpe
    token_starts = jnp.cumsum(counts) - counts
    total_blocks = block_ends[-1]

    g_ids = jnp.arange(g_max, dtype=jnp.int32)
    e_of_g = jnp.clip(jnp.searchsorted(block_ends, g_ids, side="right"), 0, E - 1)
    wib = g_ids - block_starts[e_of_g]                                      # block index within the expert
    is_real = g_ids < total_blocks
    blk_cnt = jnp.where(is_real, jnp.clip(counts[e_of_g] - wib * tn, 0, tn), 0).astype(jnp.int32)
    last_eid = e_of_g[jnp.clip(total_blocks - 1, 0, g_max - 1)]
    blk_eid = jnp.where(is_real, e_of_g, last_eid).astype(jnp.int32)        # pad blocks reuse last id -> no extra weight DMA

    r = jnp.arange(tn, dtype=jnp.int32)
    sorted_idx = token_starts[e_of_g][:, None] + wib[:, None] * tn + r[None, :]      # (g_max, tn)
    valid = (r[None, :] < blk_cnt[:, None]).reshape(-1)
    gather_idx = order[jnp.clip(sorted_idx, 0, N - 1)].reshape(-1)          # source row per grouped row
    scatter_idx = jnp.where(valid, gather_idx, N)                           # pad rows -> dummy row N

    # TODO(synk): the x gather and output scatter still cost one O(rows*D) HBM pass each in XLA;
    # fusing them into the kernel would need a manual per-row DMA gather (memory_space=pl.ANY).
    xg = x_flat[gather_idx].astype(compute_dtype)                           # (g_max*tn, D) bf16
    sides = jnp.stack([jnp.where(valid, a[gather_idx], 0.0),
                       jnp.where(valid, bcoef[gather_idx], 0.0)], axis=-1).astype(jnp.float32)

    # ---- expert weights: pad hidden to a 128 lane multiple, fuse [w1 | w2], cast to bf16
    H = params["w1"].shape[-1]
    Hp = _round_up(H, 128)
    pad_h = Hp - H
    w1p = jnp.pad(params["w1"], ((0, 0), (0, 0), (0, pad_h)))
    w2p = jnp.pad(params["w2"], ((0, 0), (0, 0), (0, pad_h)))
    w3p = jnp.pad(params["w3"], ((0, 0), (0, pad_h), (0, 0)))
    w12 = jnp.concatenate([w1p, w2p], axis=-1).astype(compute_dtype)        # (E, D, 2*Hp)
    w3c = w3p.astype(compute_dtype)                                         # (E, Hp, D)

    out_g = _moe_grouped_matmul(blk_eid, blk_cnt, sides, xg, w12, w3c,
                                hidden=Hp, out_dtype=x.dtype,
                                exact_gelu=exact_gelu, block_tokens=tn)

    out_flat = jnp.zeros((N + 1, D), out_g.dtype).at[scatter_idx].set(out_g)[:N]
    return out_flat.reshape(b, t, D).astype(x.dtype)


# --------------------------------------------------------------- pure-JAX reference check
def reference_forward(x, params, *, num_experts, top_k, expert_capacity, exact_gelu=True,
                      compute_dtype=jnp.bfloat16):
    # Mirrors the PyTorch forward (incl. the last-matching-expert-overwrites quirk) with the
    # same bf16-in / f32-accumulate matmul precision as the kernel.
    b, t, D = x.shape
    N = b * t
    x_flat = x.reshape(N, D)
    logits = x_flat.astype(jnp.float32) @ params["router_w"] + params["router_b"]
    scores, tam, eff = _routing(logits, num_experts, top_k, expert_capacity, x.dtype)
    xb = x_flat.astype(compute_dtype)
    expert_outputs = jnp.zeros((N, top_k, D), jnp.float32)
    for i in range(num_experts):                                            # mimics the torch loop
        h1 = jnp.dot(xb, params["w1"][i].astype(compute_dtype), preferred_element_type=jnp.float32)
        h2 = jnp.dot(xb, params["w2"][i].astype(compute_dtype), preferred_element_type=jnp.float32)
        h = _gelu(h2 * h1, exact_gelu)
        y = jnp.dot(h.astype(compute_dtype), params["w3"][i].astype(compute_dtype),
                    preferred_element_type=jnp.float32)
        match_any = jnp.any(eff == i, axis=-1)
        expert_outputs = jnp.where(match_any[:, None, None], y[:, None, :], expert_outputs)
    expert_outputs = jnp.where(tam[..., None] > 0, expert_outputs,
                               xb.astype(jnp.float32)[:, None, :])
    result = jnp.einsum("nkD,nk->nD", expert_outputs, scores.astype(jnp.float32))
    return result.reshape(b, t, D).astype(x.dtype)


def _probe_exact_gelu_lowering():
    # Tiny probe: does exact erf-based GELU lower in Pallas on this backend?
    def k(x_ref, o_ref):
        o_ref[...] = _gelu(x_ref[...], True)
    try:
        out = pl.pallas_call(k, out_shape=jax.ShapeDtypeStruct((8, 128), jnp.float32))(
            jnp.zeros((8, 128), jnp.float32))
        jax.block_until_ready(out)
        return True
    except Exception:
        # TODO(synk): exact erf-based GELU (PyTorch default) failed to lower on this backend;
        # falling back to the tanh approximation (the reference uses the same flag).
        return False


# -------------------------------------------------------------------------------- main
if __name__ == "__main__":
    # Lane-dense small demo: emd_dim = 128, hidden_dim = 128 (2H = 256), 8 experts, top-2.
    B, T, D, H, E, K = 2, 16, 128, 128, 8, 2
    key = jax.random.PRNGKey(0)
    k0, k1, k2, k3, k4 = jax.random.split(key, 5)
    params = dict(
        router_w=jax.random.normal(k0, (D, E), jnp.float32) * 0.02,
        router_b=jnp.zeros((E,), jnp.float32),
        w1=jax.random.normal(k1, (E, D, H), jnp.float32) * 0.02,   # Linear(emd, hidden), no bias
        w2=jax.random.normal(k2, (E, D, H), jnp.float32) * 0.02,
        w3=jax.random.normal(k3, (E, H, D), jnp.float32) * 0.02,
    )
    x = jax.random.normal(k4, (B, T, D), jnp.float32)

    exact = _probe_exact_gelu_lowering()
    capacity = 0.25                          # exercises both kept slots and capacity drops

    fwd = jax.jit(functools.partial(
        moe_block_forward, num_experts=E, top_k=K, expert_capacity=capacity,
        exact_gelu=exact, block_tokens=16, compute_dtype=jnp.bfloat16))
    out = jax.block_until_ready(fwd(x, params))

    ref = reference_forward(x, params, num_experts=E, top_k=K, expert_capacity=capacity,
                            exact_gelu=exact, compute_dtype=jnp.bfloat16)
    assert out.shape == (B, T, D)
    err = float(jnp.max(jnp.abs(out.astype(jnp.float32) - ref.astype(jnp.float32))))
    assert bool(jnp.allclose(out, ref, rtol=1e-3, atol=1e-5)), err
    print("KERNEL_OK")
</pallas_src>

<mosaic_0001>
module attributes {stable_mosaic.version = 11 : i64} {
  func.func @k(%arg0: memref<8x128xf32, #tpu.memory_space<vmem>>, %arg1: memref<8x128xf32, #tpu.memory_space<vmem>>) attributes {dimension_semantics = [], scalar_prefetch = 0 : i64, scratch_operands = 0 : i64, tpu.core_type = #tpu.core_type<tc>} {
    %c0 = arith.constant 0 : index
    %c0_0 = arith.constant 0 : index
    %0 = vector.load %arg0[%c0, %c0_0] : memref<8x128xf32, #tpu.memory_space<vmem>>, vector<8x128xf32>
    %cst = arith.constant 5.000000e-01 : f32
    %1 = vector.broadcast %cst : f32 to vector<8x128xf32>
    %2 = arith.mulf %1, %0 : vector<8x128xf32>
    %cst_1 = arith.constant 0.707106769 : f32
    %3 = vector.broadcast %cst_1 : f32 to vector<8x128xf32>
    %4 = arith.mulf %0, %3 : vector<8x128xf32>
    %5 = math.erf %4 : vector<8x128xf32>
    %cst_2 = arith.constant 1.000000e+00 : f32
    %6 = vector.broadcast %cst_2 : f32 to vector<8x128xf32>
    %7 = arith.addf %6, %5 : vector<8x128xf32>
    %8 = arith.mulf %2, %7 : vector<8x128xf32>
    %c0_3 = arith.constant 0 : index
    %c0_4 = arith.constant 0 : index
    %9 = vector.load %arg1[%c0_3, %c0_4] : memref<8x128xf32, #tpu.memory_space<vmem>>, vector<8x128xf32>
    tpu.vector_store %arg1[%c0_3, %c0_4], %8 {strides = array<i32>} : memref<8x128xf32, #tpu.memory_space<vmem>>, vector<8x128xf32>,
    return
  }
}

module attributes {stable_mosaic.version = 11 : i64} {
  func.func private @main(%arg0: i32) attributes {dimension_semantics = [#tpu.dimension_semantics<core_parallel>], iteration_bounds = array<i64: 2>, tpu.core_type = #tpu.core_type<sc_scalar_subcore>, window_params = []} {
    return
  }
}

module attributes {stable_mosaic.version = 11 : i64} {
  func.func private @main(%arg0: i32) attributes {dimension_semantics = [#tpu.dimension_semantics<core_parallel>], iteration_bounds = array<i64: 2>, tpu.core_type = #tpu.core_type<sc_scalar_subcore>, window_params = []} {
    return
  }
}

module attributes {stable_mosaic.version = 11 : i64} {
  func.func @_moe_grouped_kernel(%arg0: i32, %arg1: memref<10xi32, #tpu.memory_space<smem>>, %arg2: memref<10xi32, #tpu.memory_space<smem>>, %arg3: memref<16x2xf32, #tpu.memory_space<vmem>>, %arg4: memref<16x128xbf16, #tpu.memory_space<vmem>>, %arg5: memref<1x128x256xbf16, #tpu.memory_space<vmem>>, %arg6: memref<1x128x128xbf16, #tpu.memory_space<vmem>>, %arg7: memref<16x128xf32, #tpu.memory_space<vmem>>) attributes {dimension_semantics = [#tpu.dimension_semantics<parallel>], iteration_bounds = array<i64: 10>, scalar_prefetch = 2 : i64, scratch_operands = 0 : i64, tpu.core_type = #tpu.core_type<tc>, window_params = [{transform_indices = @transform_0, window_bounds = array<i64: 16, 2>}, {transform_indices = @transform_1, window_bounds = array<i64: 16, 128>}, {transform_indices = @transform_2, window_bounds = array<i64: 1, 128, 256>}, {transform_indices = @transform_3, window_bounds = array<i64: 1, 128, 128>}, {transform_indices = @transform_4, window_bounds = array<i64: 16, 128>}]} {
    %0 = arith.index_cast %arg0 : i32 to index
    %1 = memref.load %arg2[%0] : memref<10xi32, #tpu.memory_space<smem>>
    %c0_i32 = arith.constant 0 : i32
    %2 = arith.cmpi sgt, %1, %c0_i32 : i32
    %3 = arith.extui %2 : i1 to i32
    %c0_i32_0 = arith.constant 0 : i32
    %4 = arith.cmpi ne, %3, %c0_i32_0 : i32
    scf.if %4 {
      %c0 = arith.constant 0 : index
      %c0_3 = arith.constant 0 : index
      %10 = vector.load %arg4[%c0, %c0_3] : memref<16x128xbf16, #tpu.memory_space<vmem>>, vector<16x128xbf16>
      %c0_4 = arith.constant 0 : index
      %c0_5 = arith.constant 0 : index
      %c0_6 = arith.constant 0 : index
      %11 = vector.load %arg5[%c0_4, %c0_5, %c0_6] : memref<1x128x256xbf16, #tpu.memory_space<vmem>>, vector<1x128x256xbf16>
      %12 = vector.shape_cast %11 : vector<1x128x256xbf16> to vector<128x256xbf16>
      %cst = arith.constant dense<0.000000e+00> : vector<16x256xf32>
      %13 = tpu.matmul %10, %12, %cst {dimension_numbers = #tpu.dot_dimension_numbers<[1], [0], [0], [1], [0, 0, 1, 1], [], []>} : vector<16x128xbf16>, vector<128x256xbf16>, vector<16x256xf32> -> vector<16x256xf32>
      %14 = vector.extract_strided_slice %13 {offsets = [0, 0], sizes = [16, 128], strides = [1, 1]} : vector<16x256xf32> to vector<16x128xf32>
      %15 = vector.extract_strided_slice %13 {offsets = [0, 128], sizes = [16, 128], strides = [1, 1]} : vector<16x256xf32> to vector<16x128xf32>
      %16 = arith.mulf %14, %15 : vector<16x128xf32>
      %cst_7 = arith.constant 5.000000e-01 : f32
      %17 = vector.broadcast %cst_7 : f32 to vector<16x128xf32>
      %18 = arith.mulf %17, %16 : vector<16x128xf32>
      %cst_8 = arith.constant 4.471500e-02 : f32
      %19 = vector.broadcast %cst_8 : f32 to vector<16x128xf32>
      %20 = arith.mulf %19, %16 : vector<16x128xf32>
      %21 = arith.mulf %20, %16 : vector<16x128xf32>
      %22 = arith.mulf %21, %16 : vector<16x128xf32>
      %23 = arith.addf %16, %22 : vector<16x128xf32>
      %cst_9 = arith.constant 0.797884583 : f32
      %24 = vector.broadcast %cst_9 : f32 to vector<16x128xf32>
      %25 = arith.mulf %24, %23 : vector<16x128xf32>
      %26 = math.tanh %25 : vector<16x128xf32>
      %cst_10 = arith.constant 1.000000e+00 : f32
      %27 = vector.broadcast %cst_10 : f32 to vector<16x128xf32>
      %28 = arith.addf %27, %26 : vector<16x128xf32>
      %29 = arith.mulf %18, %28 : vector<16x128xf32>
      %30 = arith.truncf %29 : vector<16x128xf32> to vector<16x128xbf16>
      %c0_11 = arith.constant 0 : index
      %c0_12 = arith.constant 0 : index
      %c0_13 = arith.constant 0 : index
      %31 = vector.load %arg6[%c0_11, %c0_12, %c0_13] : memref<1x128x128xbf16, #tpu.memory_space<vmem>>, vector<1x128x128xbf16>
      %32 = vector.shape_cast %31 : vector<1x128x128xbf16> to vector<128x128xbf16>
      %cst_14 = arith.constant dense<0.000000e+00> : vector<16x128xf32>
      %33 = tpu.matmul %30, %32, %cst_14 {dimension_numbers = #tpu.dot_dimension_numbers<[1], [0], [0], [1], [0, 0, 1, 1], [], []>} : vector<16x128xbf16>, vector<128x128xbf16>, vector<16x128xf32> -> vector<16x128xf32>
      %c0_15 = arith.constant 0 : index
      %c0_16 = arith.constant 0 : index
      %34 = vector.load %arg3[%c0_15, %c0_16] : memref<16x2xf32, #tpu.memory_space<vmem>>, vector<16x1xf32>
      %c0_17 = arith.constant 0 : index
      %c1 = arith.constant 1 : index
      %35 = vector.load %arg3[%c0_17, %c1] : memref<16x2xf32, #tpu.memory_space<vmem>>, vector<16x1xf32>
      %36 = vector.broadcast %34 : vector<16x1xf32> to vector<16x128xf32>
      %37 = arith.mulf %36, %33 : vector<16x128xf32>
      %38 = arith.extf %10 : vector<16x128xbf16> to vector<16x128xf32>
      %39 = vector.broadcast %35 : vector<16x1xf32> to vector<16x128xf32>
      %40 = arith.mulf %39, %38 : vector<16x128xf32>
      %41 = arith.addf %37, %40 : vector<16x128xf32>
      %c0_18 = arith.constant 0 : index
      %c0_19 = arith.constant 0 : index
      %42 = vector.load %arg7[%c0_18, %c0_19] : memref<16x128xf32, #tpu.memory_space<vmem>>, vector<16x128xf32>
      tpu.vector_store %arg7[%c0_18, %c0_19], %41 {strides = array<i32>} : memref<16x128xf32, #tpu.memory_space<vmem>>, vector<16x128xf32>,
    } else {
    }
    %5 = arith.index_cast %arg0 : i32 to index
    %6 = memref.load %arg2[%5] : memref<10xi32, #tpu.memory_space<smem>>
    %c0_i32_1 = arith.constant 0 : i32
    %7 = arith.cmpi eq, %6, %c0_i32_1 : i32
    %8 = arith.extui %7 : i1 to i32
    %c0_i32_2 = arith.constant 0 : i32
    %9 = arith.cmpi ne, %8, %c0_i32_2 : i32
    scf.if %9 {
      %cst = arith.constant 0.000000e+00 : f32
      %10 = vector.broadcast %cst : f32 to vector<16x128xf32>
      %c0 = arith.constant 0 : index
      %c0_3 = arith.constant 0 : index
      %11 = vector.load %arg7[%c0, %c0_3] : memref<16x128xf32, #tpu.memory_space<vmem>>, vector<16x128xf32>
      tpu.vector_store %arg7[%c0, %c0_3], %10 {strides = array<i32>} : memref<16x128xf32, #tpu.memory_space<vmem>>, vector<16x128xf32>,
    } else {
    }
    return
  }
  func.func @transform_0(%arg0: i32, %arg1: memref<10xi32, #tpu.memory_space<smem>>, %arg2: memref<10xi32, #tpu.memory_space<smem>>) -> (i32, i32) {
    %c0_i32 = arith.constant 0 : i32
    %c0_i32_0 = arith.constant 0 : i32
    return %arg0, %c0_i32 : i32, i32
  }
  func.func @transform_1(%arg0: i32, %arg1: memref<10xi32, #tpu.memory_space<smem>>, %arg2: memref<10xi32, #tpu.memory_space<smem>>) -> (i32, i32) {
    %c0_i32 = arith.constant 0 : i32
    %c0_i32_0 = arith.constant 0 : i32
    return %arg0, %c0_i32 : i32, i32
  }
  func.func @transform_2(%arg0: i32, %arg1: memref<10xi32, #tpu.memory_space<smem>>, %arg2: memref<10xi32, #tpu.memory_space<smem>>) -> (i32, i32, i32) {
    %0 = arith.index_cast %arg0 : i32 to index
    %1 = memref.load %arg1[%0] : memref<10xi32, #tpu.memory_space<smem>>
    %c0_i32 = arith.constant 0 : i32
    %c0_i32_0 = arith.constant 0 : i32
    %c0_i32_1 = arith.constant 0 : i32
    return %1, %c0_i32, %c0_i32_0 : i32, i32, i32
  }
  func.func @transform_3(%arg0: i32, %arg1: memref<10xi32, #tpu.memory_space<smem>>, %arg2: memref<10xi32, #tpu.memory_space<smem>>) -> (i32, i32, i32) {
    %0 = arith.index_cast %arg0 : i32 to index
    %1 = memref.load %arg1[%0] : memref<10xi32, #tpu.memory_space<smem>>
    %c0_i32 = arith.constant 0 : i32
    %c0_i32_0 = arith.constant 0 : i32
    %c0_i32_1 = arith.constant 0 : i32
    return %1, %c0_i32, %c0_i32_0 : i32, i32, i32
  }
  func.func @transform_4(%arg0: i32, %arg1: memref<10xi32, #tpu.memory_space<smem>>, %arg2: memref<10xi32, #tpu.memory_space<smem>>) -> (i32, i32) {
    %c0_i32 = arith.constant 0 : i32
    %c0_i32_0 = arith.constant 0 : i32
    return %arg0, %c0_i32 : i32, i32
  }
}

</mosaic_0001>

<bundles_post_ra>
// kernel: tpu_custom_call.1
= control target key start
LH: loop header
LB: loop body
LE: loop exit
PB: predicated region body
PF: predicated region fallthrough
CT: control target
= control target key end

     0   :  { %6 = vsyncpa [#allocation3], 0  ;;  %s131_s0 = inlined_call_operand.hbm [shape: f32[8,128], index: 0, kind: input, shape index: {}]   ;;  %s132_s1 = inlined_call_operand.hbm [shape: f32[8,128], index: 1, kind: output, shape index: {}]  }
   0x1   :  { %7 = vsyncpa [#allocation4], 0  ;;  %s95_s6 = smov [#allocation2]   ;;  %s47_s10 = scalar_lea.hbm %s131_s0, 128 }
   0x2   :  { %s14_s7 = sshll.u32 %s95_s6, 4  ;;  %p48_p0 = scmp.ne.s32.totalorder %s131_s0, %s47_s10  ;;  %s15_s7 = int_to_ptr.vmem [resolvable:$true] %s14_s7 }
   0x3   :  { %p51_p1 = scmp.lt.u32.totalorder %s47_s10, %s131_s0 }
   0x5   :  { %p53_p2 = pnand %p51_p1, %p48_p0 }
   0x7   :  { %56 = shalt.err (!%p53_p2)
}
   0x8   :  { %s57_s15 = scalar_lea.vmem %s15_s7, 128  ;;  %p62_p4 = scmp.lt.s32.totalorder %s15_s7, %s15_s7 }
   0x9   :  { %p58_p3 = scmp.ne.s32.totalorder %s15_s7, %s57_s15  ;;  %p63_p5 = scmp.lt.s32.totalorder %s57_s15, %s57_s15 }
   0xb   :  { %p64_p6 = por %p63_p5, %p62_p4 }
   0xd   :  { %p65_p7 = pnand %p64_p6, %p58_p3 }
   0xf   :  { %68 = shalt.err (!%p65_p7)
}
  0x10   :  { %17 = dma.hbm_to_vmem [thread:$0]  %s131_s0, 128, %s15_s7, [#allocation3]  }
  0x11   :  { %91 = dma.done.wait [#allocation3], 128  }
  0x12   :  { %92 = vsyncadd [#allocation3], 4294967168  ;;  %v21_v0 = vld [vmem:[#allocation2] sm:$0xff]  ;;  %s96_s18 = smov [#allocation5]  }
  0x13   :  { %v23_v1 = vmul.f32 0.70710677, %v21_v0  ;;  %v22_v2 = vmul.f32 0.5, %v21_v0  ;;  %s34_s19 = sshll.u32 %s96_s18, 4  ;;  %s35_s19 = int_to_ptr.vmem [resolvable:$true] %s34_s19 }
  0x14   :  { %s69_s20 = scalar_lea.vmem %s35_s19, 128  ;;  %p74_p9 = scmp.lt.s32.totalorder %s35_s19, %s35_s19 }
  0x15   :  { %45 = verf.f32 %v23_v1  ;;  %p70_p8 = scmp.ne.s32.totalorder %s35_s19, %s69_s20  ;;  %p75_p10 = scmp.lt.s32.totalorder %s69_s20, %s69_s20 }
  0x17   :  { %p76_p11 = por %p75_p10, %p74_p9 }
  0x19   :  { %p77_p12 = pnand %p76_p11, %p70_p8 }
  0x1f   :  { %v46_v3 = vpop.eup %45 }
  0x20   :  { %v25_v4 = vadd.f32 1.0, %v46_v3 }
  0x22   :  { %v26_v5 = vmul.f32 %v25_v4, %v22_v2 }
  0x24   :  { %27 = vst [vmem:[#allocation5] sm:$0xff] %v26_v5 }
  0x25   :  { %80 = shalt.err (!%p77_p12)
}
  0x26   :  { %s81_s22 = scalar_lea.hbm %s132_s1, 128 }
  0x27   :  { %p82_p13 = scmp.ne.s32.totalorder %s132_s1, %s81_s22  ;;  %p85_p0 = scmp.lt.u32.totalorder %s81_s22, %s132_s1 }
  0x29   :  { %p87_p1 = pnand %p85_p0, %p82_p13 }
  0x2b   :  { %90 = shalt.err (!%p87_p1)
}
  0x2c   :  { %37 = dma.vmem_to_hbm [thread:$0]  %s35_s19, 128, %s132_s1, [#allocation4]  }
  0x2d   :  { %93 = dma.done.wait [#allocation4], 128  }
  0x2e   :  { %94 = vsyncadd [#allocation4], 4294967168 }
  0x2f   :  { %41 = vsyncpa [#allocation3], 1 }
  0x30   :  { %42 = vsyncpa [#allocation4], 1 }

// kernel: custom-call.1
= control target key start
LH: loop header
LB: loop body
LE: loop exit
PB: predicated region body
PF: predicated region fallthrough
CT: control target
= control target key end

     0   :  { %s6_s0 = inlined_call_operand.vmem [shape: u32[10], index: 0, kind: output, shape index: {}]  }

// kernel: moe_block_forward.1
= control target key start
LH: loop header
LB: loop body
LE: loop exit
PB: predicated region body
PF: predicated region fallthrough
CT: control target
= control target key end

     0   :  { %s989_s0 = inlined_call_operand.vmem [shape: s32[10], index: 0, kind: input, shape index: {}]   ;;  %s990_s2 = inlined_call_operand.vmem [shape: f32[160,2], index: 2, kind: input, shape index: {}]   ;;  %s991_s3 = inlined_call_operand.vmem [shape: bf16[160,128], index: 3, kind: input, shape index: {}]   ;;  %s992_s4 = inlined_call_operand.vmem [shape: bf16[8,128,256], index: 4, kind: input, shape index: {}]   ;;  %s993_s5 = inlined_call_operand.vmem [shape: bf16[8,128,128], index: 5, kind: input, shape index: {}]   ;;  %s994_s6 = inlined_call_operand.vmem [shape: f32[160,128], index: 6, kind: output, shape index: {}]   ;;  %s995_s1 = inlined_call_operand.vmem [shape: s32[10], index: 1, kind: input, shape index: {}]  }
   0x1   :  { %s11_s23 = sshll.u32 %s989_s0, 4  ;;  %s15_s26 = sshll.u32 %s995_s1, 4  ;;  %s12_s23 = int_to_ptr.vmem [resolvable:$true] %s11_s23  ;;  %s16_s26 = int_to_ptr.vmem [resolvable:$true] %s15_s26 }
   0x2   :  { %s828_s27 = scalar_lea.vmem %s12_s23, 16  ;;  %p833_p1 = scmp.lt.s32.totalorder %s12_s23, %s12_s23 }
   0x3   :  { %p829_p0 = scmp.ne.s32.totalorder %s12_s23, %s828_s27  ;;  %p834_p2 = scmp.lt.s32.totalorder %s828_s27, %s828_s27 }
   0x5   :  { %p835_p3 = por %p834_p2, %p833_p1 }
   0x7   :  { %p836_p4 = pnand %p835_p3, %p829_p0 }
   0x9   :  { %839 = shalt.err (!%p836_p4)  }
   0xa   :  { %s862_s28 = smov [#allocation3]   ;;  %s840_s29 = scalar_lea.vmem %s16_s26, 16 }
   0xb   :  { %14 = dma.vmem_to_smem %s12_s23, 16, %s862_s28, [#allocation2] }
   0xc   :  { %p841_p5 = scmp.ne.s32.totalorder %s16_s26, %s840_s29  ;;  %p845_p6 = scmp.lt.s32.totalorder %s16_s26, %s16_s26 }
   0xd   :  { %p846_p7 = scmp.lt.s32.totalorder %s840_s29, %s840_s29 }
   0xf   :  { %p847_p8 = por %p846_p7, %p845_p6 }
  0x11   :  { %p848_p9 = pnand %p847_p8, %p841_p5 }
  0x13   :  { %851 = shalt.err (!%p848_p9)  }
  0x14   :  { %s863_s0 = smov [#allocation4]  }
  0x15   :  { %18 = dma.vmem_to_smem %s16_s26, 16, %s863_s0, [#allocation2] }
  0x16   :  { %856 = dma.done.wait [#allocation2], 32 }
  0x17   :  { %857 = vsyncadd [#allocation2], 4294967264 }
  0x18   :  { %20 = sfence }
  0x19   :  { %s910_s1 = smov 0  }
  0x1a LB: > { %s916_s30 = sadd.s32 4294967295, %s860_s1   ;;  %p701_p10 = scmp.ge.s32.totalorder %s860_s1, 1  ;;  %s860_s1 = sphi %s910_s1, %s26_s1  }
  0x1b   : > { %p214_p11 = scmp.lt.s32.totalorder %s860_s1, 11 }
  0x1d   : > { %p215_p12 = pnand %p701_p10, %p214_p11 }
  0x1e   : > { %s702_s7 = sshll.u32 (!%p215_p12), %s916_s30, 1  ;;  %s269_s8 = sld [smem:[#allocation3 + %s916_s30]] (!%p215_p12) }
  0x1f   : > { %218 = sbr.rel (%p215_p12) target bundleno = 557 (0x22d), region = 36  ;;  %p258_p13 = scmp.lt.s32.totalorder (!%p215_p12), %s702_s7, 19 }
  0x20   : > { %s276_s9 = sld [smem:[#allocation3 + %s916_s30]] (!%p215_p12) }
  0x21   : > { %s290_s10 = sld [smem:[#allocation4 + %s916_s30]] (!%p215_p12) }
  0x24   : > { %p270_p0 = scmp.lt.s32.totalorder (!%p215_p12), %s269_s8, 7 }
  0x26   : > { %s997_s7 = smov (!%p258_p13, %s702_s7), 19  ;;  %p277_p1 = scmp.lt.s32.totalorder %s276_s9, 7 }
  0x27   : > { %s703_s11 = sshll.u32 %s997_s7, 3  ;;  %s705_s12 = sshll.u32 %s997_s7, 2 }
  0x28   : > { %s927_s15 = scalar_lea.vmem %s990_s2, %s703_s11  ;;  %s932_s18 = scalar_lea.vmem %s991_s3, %s705_s12 }
  0x29   : > { %s937_s21 = scalar_lea.vmem %s994_s6, %s703_s11  ;;  %s999_s8 = smov (!%p270_p0, %s269_s8), 7 }
  0x2a   : > { %s1001_s9 = smov (!%p277_p1, %s276_s9), 7  ;;  %s741_s22 = sshll.u32 %s999_s8, 7 }
  0x2b   : > { %s942_s25 = scalar_lea.vmem %s992_s4, %s741_s22  ;;  %s742_s26 = sshll.u32 %s1001_s9, 6 }
  0x2c   : > { %s947_s29 = scalar_lea.vmem %s993_s5, %s742_s26  ;;  %p712_p2 = scmp.le.s32.totalorder %s290_s10, 0 }
  0x2d   : > { %v790_v0 = vld [vmem:[%s942_s25 + $0x4] ss:$8 sps:$4 sm:$0xff] (!%p712_p2)   ;;  %v792_v1 = vld [vmem:[%s942_s25] ss:$8 sps:$4 sm:$0xff] (!%p712_p2)   ;;  %v864_v2 = vmov (!%p712_p2), 0   ;;  %v865_v19 = vmov (!%p712_p2), 0.0  }
  0x2e   : > { %294 = sbr.rel (%p712_p2) target bundleno = 542 (0x21e), region = 40  ;;  %431 = vmatprep.mubr.bf16.mxu0 (!%p712_p2), %v864_v2  ;;  %787 = vset.pattern.permute.xlu0 (!%p712_p2), %v864_v2  ;;  %v793_v3 = vld [vmem:[%s942_s25 + $0x14] ss:$8 sps:$4 sm:$0xff] (!%p712_p2)   ;;  %v795_v4 = vld [vmem:[%s942_s25 + $0x10] ss:$8 sps:$4 sm:$0xff] (!%p712_p2)   ;;  %v966_v17 = vld [vmem:[%s932_s18] sm:$0xff] (!%p712_p2)  }
  0x2f   : > { %399 = vmatprep.subr.bf16.mxu0 (!%p712_p2), %v790_v0  ;;  %v796_v5 = vld [vmem:[%s942_s25 + $0x24] ss:$8 sps:$4 sm:$0xff] (!%p712_p2)   ;;  %v798_v6 = vld [vmem:[%s942_s25 + $0x20] ss:$8 sps:$4 sm:$0xff] (!%p712_p2)   ;;  %v799_v7 = vld [vmem:[%s942_s25 + $0x34] ss:$8 sps:$4 sm:$0xff] (!%p712_p2)   ;;  %752 = vmatprep.subr.bf16.mxu1 (!%p712_p2), %v865_v19  ;;  %v582_v57 = vunpack.c.l.bf16 (!%p712_p2), %v966_v17  ;;  %v583_v58 = vunpack.c.h.bf16 (!%p712_p2), %v966_v17 }
  0x30   : > { %400 = vmatpush1.bf16.msra.mxu0 (!%p712_p2), %v792_v1  ;;  %v801_v8 = vld [vmem:[%s942_s25 + $0x30] ss:$8 sps:$4 sm:$0xff] (!%p712_p2)   ;;  %v802_v9 = vld [vmem:[%s942_s25 + $0x44] ss:$8 sps:$4 sm:$0xff] (!%p712_p2)   ;;  %v804_v10 = vld [vmem:[%s942_s25 + $0x40] ss:$8 sps:$4 sm:$0xff] (!%p712_p2)  }
  0x31   : > { %401 = vmatprep.subr.bf16.mxu0 (!%p712_p2), %v793_v3  ;;  %v805_v11 = vld [vmem:[%s942_s25 + $0x54] ss:$8 sps:$4 sm:$0xff] (!%p712_p2)   ;;  %v807_v12 = vld [vmem:[%s942_s25 + $0x50] ss:$8 sps:$4 sm:$0xff] (!%p712_p2)   ;;  %v808_v13 = vld [vmem:[%s942_s25 + $0x64] ss:$8 sps:$4 sm:$0xff] (!%p712_p2)  }
  0x32   : > { %v810_v14 = vld [vmem:[%s942_s25 + $0x60] ss:$8 sps:$4 sm:$0xff] (!%p712_p2)   ;;  %v811_v15 = vld [vmem:[%s942_s25 + $0x74] ss:$8 sps:$4 sm:$0xff] (!%p712_p2)   ;;  %v813_v16 = vld [vmem:[%s942_s25 + $0x70] ss:$8 sps:$4 sm:$0xff] (!%p712_p2)  }
  0x33   : > { %v815_v18 = vld [vmem:[%s947_s29] sm:$0xff] (!%p712_p2)   ;;  %v816_v20 = vld [vmem:[%s947_s29 + $0x8] sm:$0xff] (!%p712_p2)   ;;  %v817_v21 = vld [vmem:[%s947_s29 + $0x10] sm:$0xff] (!%p712_p2)   ;;  %vm866_vm0 = vmmov (!%p712_p2), 0   ;;  %v867_v28 = vmov (!%p712_p2), 1  }
  0x34   : > { %402 = vmatpush1.bf16.msra.mxu0 (!%p712_p2), %v795_v4  ;;  %753 = vmatpush3.bf16.msra.mxu1 (!%p712_p2), %v815_v18  ;;  %v818_v22 = vld [vmem:[%s947_s29 + $0x18] sm:$0xff] (!%p712_p2)   ;;  %v819_v23 = vld [vmem:[%s947_s29 + $0x20] sm:$0xff] (!%p712_p2)   ;;  %v820_v24 = vld [vmem:[%s947_s29 + $0x28] sm:$0xff] (!%p712_p2)  }
  0x35   : > { %403 = vmatprep.subr.bf16.mxu0 %v796_v5  ;;  %754 = vmatprep.subr.bf16.mxu1 %v865_v19  ;;  %v821_v25 = vld [vmem:[%s947_s29 + $0x30] sm:$0xff]   ;;  %v822_v26 = vld [vmem:[%s947_s29 + $0x38] sm:$0xff]   ;;  %v568_v27 = vld [vmem:[%s927_s15] sm:$0xff] }
  0x36   : > { %768 = vmatprep.mubr.msk.bf16.mxu1 %vm866_vm0, %v865_v19  ;;  %788 = vset.pattern.permute.xlu1 %v867_v28  ;;  %v569_v29 = vld [vmem:[%s927_s15 + $0x8] sm:$0xff] }
  0x37   : > { %572 = vperm.xlu0 %787, %v568_v27   ;;  %585 = vperm.xlu1 %788, %v568_v27  }
  0x38   : > { %404 = vmatpush1.bf16.msra.mxu0 %v798_v6  ;;  %755 = vmatpush3.bf16.msra.mxu1 %v816_v20 }
  0x39   : > { %405 = vmatprep.subr.bf16.mxu0 %v799_v7  ;;  %756 = vmatprep.subr.bf16.mxu1 %v865_v19 }
  0x3b   : > { %577 = vperm.xlu0 %787, %v569_v29   ;;  %589 = vperm.xlu1 %788, %v569_v29  }
  0x3c   : > { %406 = vmatpush1.bf16.msra.mxu0 %v801_v8  ;;  %757 = vmatpush3.bf16.msra.mxu1 %v817_v21 }
  0x3d   : > { %407 = vmatprep.subr.bf16.mxu0 %v802_v9  ;;  %758 = vmatprep.subr.bf16.mxu1 %v865_v19 }
  0x3f   : > { %789 = vset.pattern.permute.xlu0 %v867_v28 }
  0x40   : > { %408 = vmatpush1.bf16.msra.mxu0 %v804_v10  ;;  %759 = vmatpush3.bf16.msra.mxu1 %v818_v22 }
  0x41   : > { %409 = vmatprep.subr.bf16.mxu0 %v805_v11  ;;  %760 = vmatprep.subr.bf16.mxu1 %v865_v19 }
  0x44   : > { %410 = vmatpush1.bf16.msra.mxu0 %v807_v12  ;;  %761 = vmatpush3.bf16.msra.mxu1 %v819_v23 }
  0x45   : > { %411 = vmatprep.subr.bf16.mxu0 %v808_v13  ;;  %762 = vmatprep.subr.bf16.mxu1 %v865_v19 }
  0x48   : > { %412 = vmatpush1.bf16.msra.mxu0 %v810_v14  ;;  %763 = vmatpush3.bf16.msra.mxu1 %v820_v24 }
  0x49   : > { %413 = vmatprep.subr.bf16.mxu0 %v811_v15  ;;  %764 = vmatprep.subr.bf16.mxu1 %v865_v19 }
  0x4c   : > { %414 = vmatpush1.bf16.msra.mxu0 %v813_v16  ;;  %765 = vmatpush3.bf16.msra.mxu1 %v821_v25 }
  0x4d   : > { %766 = vmatprep.subr.bf16.mxu1 %v865_v19 }
  0x4f   : > { %432 = vmatmul.mubr.bf16.vlgmr.msra.gmra.mrb[0].mxu0 %v966_v17 }
  0x50   : > { %767 = vmatpush3.bf16.msra.mxu1 %v822_v26 }
  0xb6   : > { %v586_v55 = vpop.permute.xlu1 %585  ;;  %v573_v56 = vpop.permute.xlu0 %572 }
  0xb7   : > { %v592_v61 = vmul.f32 %v586_v55, %v582_v57 }
  0xba   : > { %v590_v59 = vpop.permute.xlu1 %589  ;;  %v578_v0 = vpop.permute.xlu0 %577 }
  0xbb   : > { %v593_v2 = vmul.f32 %v590_v59, %v583_v58 }
 0x122   : > { %v433_v30 = vpop.f32.mrb[0].mxu0 }
 0x123   : > { %v435_v31 = vpop.f32.mrb[1].mxu0 }
 0x124   : > { %v442_v32 = vmul.f32 %v435_v31, %v433_v30  ;;  %v437_v33 = vpop.f32.mrb[2].mxu0 }
 0x125   : > { %v439_v34 = vpop.f32.mrb[3].mxu0 }
 0x126   : > { %v446_v35 = vmul.f32 0.044715, %v442_v32  ;;  %v443_v36 = vmul.f32 %v439_v34, %v437_v33  ;;  %v444_v49 = vmul.f32 0.5, %v442_v32 }
 0x128   : > { %v448_v37 = vmul.f32 %v446_v35, %v442_v32  ;;  %v447_v38 = vmul.f32 0.044715, %v443_v36  ;;  %v445_v50 = vmul.f32 0.5, %v443_v36 }
 0x12a   : > { %v450_v39 = vmul.f32 %v448_v37, %v442_v32  ;;  %v449_v40 = vmul.f32 %v447_v38, %v443_v36 }
 0x12c   : > { %v451_v41 = vmul.f32 %v449_v40, %v443_v36  ;;  %v452_v42 = vadd.f32 %v450_v39, %v442_v32 }
 0x12e   : > { %v453_v43 = vadd.f32 %v451_v41, %v443_v36  ;;  %v454_v44 = vmul.f32 0.7978846, %v452_v42 }
 0x130   : > { %v455_v45 = vmul.f32 0.7978846, %v453_v43  ;;  %824 = vtanh.f32 %v454_v44 }
 0x132   : > { %826 = vtanh.f32 %v455_v45 }
 0x13a   : > { %v825_v46 = vpop.eup %824 }
 0x13b   : > { %v458_v47 = vadd.f32 1.0, %v825_v46 }
 0x13c   : > { %v827_v48 = vpop.eup %826 }
 0x13d   : > { %v459_v51 = vadd.f32 1.0, %v827_v48  ;;  %v460_v52 = vmul.f32 %v458_v47, %v444_v49 }
 0x13f   : > { %v461_v53 = vmul.f32 %v459_v51, %v445_v50 }
 0x141   : > { %v462_v54 = vpack.c.bf16 %v461_v53, %v460_v52 }
 0x143   : > { %769 = vmatmul.mubr.bf16.vlgmr.msra.gmra.mrb[0].mxu1 %v462_v54 }
 0x216   : > { %v561_v60 = vpop.f32.mrb[0].mxu1 }
 0x217   : > { %v580_v62 = vmul.f32 %v573_v56, %v561_v60  ;;  %v770_v63 = vpop.f32.mrb[1].mxu1 }
 0x218   : > { %v564_v1 = vpop.f32.mrb[2].mxu1 }
 0x219   : > { %v594_v3 = vadd.f32 %v592_v61, %v580_v62  ;;  %v581_v4 = vmul.f32 %v578_v0, %v564_v1  ;;  %v771_v5 = vpop.f32.mrb[3].mxu1 }
 0x21b   : > { %596 = vst [vmem:[%s937_s21] sm:$0xff] %v594_v3  ;;  %v595_v6 = vadd.f32 %v593_v2, %v581_v4 }
 0x21d   : > { %597 = vst [vmem:[%s937_s21 + $0x8] sm:$0xff] %v595_v6 }
 0x21e PF: > { %s598_s0 = sld [smem:[#allocation4 + %s916_s30]] }
 0x224   : > { %p738_p3 = scmp.ne.s32.totalorder %s598_s0, 0 }
 0x225   : > { %v868_v7 = vmov (!%p738_p3), 0.0  }
 0x226   : > { %602 = sbr.rel (%p738_p3) target bundleno = 557 (0x22d), region = 44  ;;  %603 = vst [vmem:[%s937_s21] sm:$0xff] (!%p738_p3), %v868_v7  ;;  %604 = vst [vmem:[%s937_s21 + $0x8] sm:$0xff] (!%p738_p3), %v868_v7 }
 0x22d PF: > { %s26_s1 = sadd.s32 1, %s860_s1  }
 0x22e   : > { %p23_p4 = scmp.ge.s32.totalorder %s26_s1, 12  }
 0x230   :  { %25 = sbr.rel (!%p23_p4) target bundleno = 26 (0x1a), region = 83 }

</bundles_post_ra>
